<compile_context>
chip_gen: v7x
topology: tpu7x:2x2x1
jax: 0.10.0
libtpu: 0.0.40
codegen_flags: <defaults>
</compile_context>

<pallas_src>
import functools

import jax
import jax.numpy as jnp
from jax.experimental import pallas as pl
from jax.experimental.pallas import tpu as pltpu


# -----------------------------------------------------------------------------
# Chip-aware budgets & tile helpers
# -----------------------------------------------------------------------------
def _chip_budgets():
    """Returns (max bytes per VMEM block, floor for vmem_limit_bytes)."""
    try:
        vmem_cap = pltpu.get_tpu_info().vmem_capacity_bytes
    except Exception:  # conservative default if the query is unavailable
        vmem_cap = 64 * 1024 * 1024
    if vmem_cap >= 96 * 1024 * 1024:            # v5e / v6e: 128 MiB physical VMEM
        return 6 * 1024 * 1024, 64 * 1024 * 1024
    return 2 * 1024 * 1024, 32 * 1024 * 1024    # v7x: 64 MiB physical VMEM


def _largest_divisor_leq(n, cap):
    cap = int(max(1, min(n, cap)))
    for d in range(cap, 0, -1):
        if n % d == 0:
            return d
    return 1


def _pick_hw_tile(hw, cpg, itemsize, max_block_bytes):
    """Largest 128-multiple divisor of hw keeping one (cpg, hw_tile) slab under
    max_block_bytes.  Returns None if hw has no 128-aligned divisor."""
    if hw % 128 != 0:
        return None
    cap_lanes = max(1, (max_block_bytes // max(1, cpg * itemsize)) // 128)
    return 128 * _largest_divisor_leq(hw // 128, cap_lanes)


# -----------------------------------------------------------------------------
# Kernels
# -----------------------------------------------------------------------------
def _copy_relu_scale_kernel(x_ref, o_ref, *, apply_relu, res_scale):
    """Dense elementwise tail.  x_ref and o_ref are same-shaped VMEM blocks;
    on the lane-dense shuffle path the permutation has already been done by the
    BlockSpec index maps, so this is a full-block load, one ReLU, one scale and
    a single unmasked 128-lane store."""
    x = x_ref[...]
    if apply_relu:
        x = jnp.maximum(x, 0)
    if res_scale != 1.0:
        x = x * jnp.asarray(res_scale, dtype=x.dtype)
    o_ref[...] = x


def _rowcopy_kernel(x_ref, o_ref, *, groups, cpg, apply_relu, res_scale):
    """Fallback (only for H*W % 128 != 0, i.e. small/odd spatial extents):
    per-channel sublane copies with identical in/out index maps.  Known-good;
    perf is irrelevant on this path."""
    num_channels = groups * cpg
    for co in range(num_channels):
        ci = (co % groups) * cpg + (co // groups)
        row = x_ref[:, ci, :]
        if apply_relu:
            row = jnp.maximum(row, 0)
        if res_scale != 1.0:
            row = row * jnp.asarray(res_scale, dtype=row.dtype)
        o_ref[:, co, :] = row


# -----------------------------------------------------------------------------
# pallas_call wrappers (three paths)
# -----------------------------------------------------------------------------
def _shuffle_lane_dense(x, g, cpg, HW, apply_relu, res_scale,
                        max_block_bytes, vmem_floor, cost):
    """Hot path: permutation via index maps, dense blocks, H*W % 128 == 0."""
    B, C, H, W = x.shape
    itemsize = x.dtype.itemsize

    hw_tile = _pick_hw_tile(HW, cpg, itemsize, max_block_bytes)
    b_tile = _largest_divisor_leq(
        B, max(1, max_block_bytes // (cpg * hw_tile * itemsize)))
    n_hw = HW // hw_tile

    # Never collapse a medium/large tensor into a single grid step: keep the
    # DMA pipeline double-buffered and both v7x TensorCores busy.
    if (B // b_tile) * g * n_hw == 1 and B * C * HW * itemsize > (1 << 20):
        if HW // 128 >= 2:
            hw_tile = 128 * _largest_divisor_leq(HW // 128, max(1, (HW // 128) // 2))
            n_hw = HW // hw_tile
        elif B >= 2:
            b_tile = _largest_divisor_leq(B, max(1, B // 2))

    grid = (B // b_tile, g, n_hw)
    block_bytes = b_tile * cpg * hw_tile * itemsize
    vmem_limit = int(max(vmem_floor, 4 * block_bytes + (1 << 20)))

    kernel = functools.partial(_copy_relu_scale_kernel,
                               apply_relu=apply_relu, res_scale=res_scale)

    # Input viewed as (B, g, cpg, HW); output produced as (B, cpg, g*HW), which
    # reshapes contiguously (for free) to the shuffled (B, C, H, W).
    x4 = x.reshape(B, g, cpg, HW)
    n_hw_final = n_hw  # captured by the index maps below

    out = pl.pallas_call(
        kernel,
        out_shape=jax.ShapeDtypeStruct((B, cpg, g * HW), x.dtype),
        grid=grid,
        in_specs=[pl.BlockSpec((b_tile, None, cpg, hw_tile),
                               lambda b, gi, t: (b, gi, 0, t))],
        out_specs=pl.BlockSpec((b_tile, cpg, hw_tile),
                               lambda b, gi, t: (b, 0, gi * n_hw_final + t)),
        compiler_params=pltpu.CompilerParams(
            # Every output block is written exactly once and all steps are
            # independent -> all axes parallel (v7x megacore sharding).
            dimension_semantics=("parallel", "parallel", "parallel"),
            vmem_limit_bytes=vmem_limit,
        ),
        cost_estimate=cost,
    )(x4)
    return out.reshape(B, C, H, W)


def _relu_scale_elementwise(x, HW, apply_relu, res_scale,
                            max_block_bytes, vmem_floor, cost):
    """groups == 1 (identity shuffle) with odd H*W: pure fused elementwise."""
    B, C, H, W = x.shape
    itemsize = x.dtype.itemsize
    x2 = x.reshape(B, C, HW)
    b_tile = _largest_divisor_leq(B, max(1, max_block_bytes // (C * HW * itemsize)))
    grid = (pl.cdiv(B, b_tile),)
    block_bytes = b_tile * C * HW * itemsize
    vmem_limit = int(max(vmem_floor, 4 * block_bytes + (1 << 20)))

    kernel = functools.partial(_copy_relu_scale_kernel,
                               apply_relu=apply_relu, res_scale=res_scale)
    spec = pl.BlockSpec((b_tile, C, HW), lambda b: (b, 0, 0))
    out = pl.pallas_call(
        kernel,
        out_shape=jax.ShapeDtypeStruct((B, C, HW), x.dtype),
        grid=grid,
        in_specs=[spec],
        out_specs=spec,
        compiler_params=pltpu.CompilerParams(
            dimension_semantics=("parallel",),
            vmem_limit_bytes=vmem_limit,
        ),
        cost_estimate=cost,
    )(x2)
    return out.reshape(B, C, H, W)


def _shuffle_rowcopy(x, groups, cpg, HW, apply_relu, res_scale, vmem_floor, cost):
    """Fallback: groups > 1 and H*W not a multiple of 128 (small/odd spatial)."""
    B, C, H, W = x.shape
    itemsize = x.dtype.itemsize
    x2 = x.reshape(B, C, HW)
    # The in-kernel permutation needs the full channel extent; only tile batch.
    b_tile = 1 if B * C * HW * itemsize > (2 << 20) else B
    grid = (pl.cdiv(B, b_tile),)
    block_bytes = b_tile * C * HW * itemsize
    # TODO(synk): for (pathological) huge-C / odd-HW tensors this block may not
    # fit VMEM; such shapes should pad H*W up to a multiple of 128 instead.
    vmem_limit = int(max(vmem_floor, 4 * block_bytes + (1 << 20)))

    kernel = functools.partial(_rowcopy_kernel, groups=groups, cpg=cpg,
                               apply_relu=apply_relu, res_scale=res_scale)
    spec = pl.BlockSpec((b_tile, C, HW), lambda b: (b, 0, 0))
    out = pl.pallas_call(
        kernel,
        out_shape=jax.ShapeDtypeStruct((B, C, HW), x.dtype),
        grid=grid,
        in_specs=[spec],
        out_specs=spec,
        compiler_params=pltpu.CompilerParams(
            dimension_semantics=("parallel",),
            vmem_limit_bytes=vmem_limit,
        ),
        cost_estimate=cost,
    )(x2)
    return out.reshape(B, C, H, W)


def _shuffle_pallas_impl(x, groups, *, apply_relu=False, res_scale=1.0):
    B, C, H, W = x.shape
    if C % groups != 0:
        raise ValueError("num_channels must be divisible by groups")
    cpg = C // groups
    HW = H * W
    itemsize = x.dtype.itemsize
    res_scale = float(res_scale)
    max_block_bytes, vmem_floor = _chip_budgets()

    total = B * C * HW
    cost = pl.CostEstimate(
        flops=total * (int(apply_relu) + int(res_scale != 1.0)),
        transcendentals=0,
        bytes_accessed=2 * total * itemsize,
    )

    if HW % 128 == 0:
        return _shuffle_lane_dense(x, groups, cpg, HW, apply_relu, res_scale,
                                   max_block_bytes, vmem_floor, cost)
    if groups == 1:
        return _relu_scale_elementwise(x, HW, apply_relu, res_scale,
                                       max_block_bytes, vmem_floor, cost)
    return _shuffle_rowcopy(x, groups, cpg, HW, apply_relu, res_scale,
                            vmem_floor, cost)


def channel_shuffle_pallas(x: jax.Array, groups: int) -> jax.Array:
    """Pure channel shuffle (exact match of torch channel_shuffle, NCHW)."""
    return _shuffle_pallas_impl(x, groups)


def shuffle_relu_scale_pallas(x: jax.Array, groups: int, res_scale: float = 1.0) -> jax.Array:
    """Fused channel_shuffle -> ReLU -> * res_scale (ShuffleBlock tail)."""
    return _shuffle_pallas_impl(x, groups, apply_relu=True, res_scale=res_scale)


# -----------------------------------------------------------------------------
# Module wrappers
# -----------------------------------------------------------------------------
class ChannelShuffle:
    """Mirror of the PyTorch Channel_Shuffle module (no parameters)."""

    def __init__(self, conv_groups: int):
        self.conv_groups = conv_groups

    def __call__(self, x: jax.Array) -> jax.Array:
        return channel_shuffle_pallas(x, self.conv_groups)


Channel_Shuffle = ChannelShuffle  # alias matching the PyTorch name


def _conv2d_nchw(x, w, b=None):
    """'same'-padded NCHW conv (the spec's injected `conv`, e.g. default_conv)."""
    kh, kw = w.shape[-2], w.shape[-1]
    y = jax.lax.conv_general_dilated(
        x, w, window_strides=(1, 1),
        padding=[(kh // 2, kh // 2), (kw // 2, kw // 2)],
        dimension_numbers=("NCHW", "OIHW", "NCHW"))
    if b is not None:
        y = y + b[None, :, None, None]
    return y


class ShuffleBlock:
    """JAX mirror of ShuffleBlock.forward (bn=False, act=ReLU defaults):

        y = ReLU(channel_shuffle(conv(x), conv_groups)) * res_scale

    With fold_shuffle=True (default) the channel permutation is folded into the
    conv's output-channel weight/bias order (valid because the injected conv is
    an ungrouped dense conv), so the shuffle costs zero extra HBM traffic and
    only the ReLU * res_scale tail runs as a Pallas kernel.  With
    fold_shuffle=False the conv runs unmodified and the fused
    shuffle + ReLU + res_scale Pallas kernel handles the rest.
    """
    # TODO(synk): the conv itself is a constructor-injected external dependency
    # in the PyTorch spec and stays a plain-XLA convolution here.

    def __init__(self, weight, bias=None, conv_groups: int = 1,
                 res_scale: float = 1.0, fold_shuffle: bool = True):
        self.conv_groups = conv_groups
        self.res_scale = float(res_scale)
        c_out = weight.shape[0]
        self.fold_shuffle = bool(fold_shuffle) and conv_groups > 1 and c_out % conv_groups == 0
        if self.fold_shuffle:
            cpg = c_out // conv_groups
            perm = jnp.asarray(
                [(co % conv_groups) * cpg + co // conv_groups for co in range(c_out)],
                dtype=jnp.int32)
            weight = jnp.take(weight, perm, axis=0)
            if bias is not None:
                bias = jnp.take(bias, perm, axis=0)
        self.weight = weight          # (C_out, C_in, kh, kw)
        self.bias = bias              # (C_out,) or None

    def __call__(self, x: jax.Array) -> jax.Array:
        y = _conv2d_nchw(x, self.weight, self.bias)
        if self.fold_shuffle:
            # Shuffle already baked into the conv's output-channel order.
            return _shuffle_pallas_impl(y, 1, apply_relu=True, res_scale=self.res_scale)
        return shuffle_relu_scale_pallas(y, self.conv_groups, self.res_scale)


# -----------------------------------------------------------------------------
# Plain-JAX references
# -----------------------------------------------------------------------------
def _channel_shuffle_ref(x, groups):
    B, C, H, W = x.shape
    cpg = C // groups
    x = x.reshape(B, groups, cpg, H, W)
    x = jnp.transpose(x, (0, 2, 1, 3, 4))
    return x.reshape(B, C, H, W)


def _shuffle_block_ref(x, weight, bias, groups, res_scale):
    y = _conv2d_nchw(x, weight, bias)
    y = _channel_shuffle_ref(y, groups)
    return jnp.maximum(y, 0) * jnp.asarray(res_scale, y.dtype)


# -----------------------------------------------------------------------------
# Self-test
# -----------------------------------------------------------------------------
if __name__ == "__main__":
    key = jax.random.PRNGKey(0)
    k1, k2, k3, k4, k5 = jax.random.split(key, 5)

    # 1) Pure channel shuffle, f32, H*W = 256 (lane-dense hot path).
    B, C, H, W, g = 2, 4, 16, 16, 2
    x = jax.random.normal(k1, (B, C, H, W), dtype=jnp.float32)
    out = jax.block_until_ready(ChannelShuffle(g)(x))
    assert out.shape == (B, C, H, W) and out.dtype == x.dtype
    assert jnp.array_equal(out, _channel_shuffle_ref(x, g)), "shuffle mismatch (f32)"

    # 2) Odd spatial extent (H*W = 63 -> row-copy fallback path).
    x2 = jax.random.normal(k2, (1, 12, 7, 9), dtype=jnp.float32)
    out2 = jax.block_until_ready(channel_shuffle_pallas(x2, 3))
    assert jnp.array_equal(out2, _channel_shuffle_ref(x2, 3)), "shuffle mismatch (odd)"

    # 3) bf16 on the lane-dense hot path (no packed-dtype RMW stores).
    x3 = jax.random.normal(k3, (2, 6, 16, 16), dtype=jnp.float32).astype(jnp.bfloat16)
    out3 = jax.block_until_ready(channel_shuffle_pallas(x3, 3))
    assert jnp.array_equal(out3, _channel_shuffle_ref(x3, 3)), "shuffle mismatch (bf16)"

    # 4) Full ShuffleBlock forward, shuffle folded into the conv weights
    #    (default) and the fused Pallas shuffle path (fold_shuffle=False).
    w = 0.1 * jax.random.normal(k4, (C, C, 3, 3), dtype=jnp.float32)
    b = 0.1 * jax.random.normal(k5, (C,), dtype=jnp.float32)
    ref4 = _shuffle_block_ref(x, w, b, g, 0.5)

    out4 = jax.block_until_ready(ShuffleBlock(w, b, conv_groups=g, res_scale=0.5)(x))
    assert jnp.allclose(out4, ref4, rtol=1e-5, atol=1e-5), "ShuffleBlock (folded) mismatch"

    out5 = jax.block_until_ready(
        ShuffleBlock(w, b, conv_groups=g, res_scale=0.5, fold_shuffle=False)(x))
    assert jnp.allclose(out5, ref4, rtol=1e-5, atol=1e-5), "ShuffleBlock (fused) mismatch"

    print("KERNEL_OK")
</pallas_src>

<mosaic_0001>
module attributes {stable_mosaic.version = 11 : i64} {
  func.func @_copy_relu_scale_kernel(%arg0: i32, %arg1: i32, %arg2: i32, %arg3: memref<2x1x2x256xf32, #tpu.memory_space<vmem>>, %arg4: memref<2x2x256xf32, #tpu.memory_space<vmem>>) attributes {dimension_semantics = [#tpu.dimension_semantics<parallel>, #tpu.dimension_semantics<parallel>, #tpu.dimension_semantics<parallel>], iteration_bounds = array<i64: 1, 2, 1>, scalar_prefetch = 0 : i64, scratch_operands = 0 : i64, tpu.core_type = #tpu.core_type<tc>, window_params = [{transform_indices = @transform_0, window_bounds = array<i64: 2, 1, 2, 256>}, {transform_indices = @transform_1, window_bounds = array<i64: 2, 2, 256>}]} {
    %c0 = arith.constant 0 : index
    %c0_0 = arith.constant 0 : index
    %c0_1 = arith.constant 0 : index
    %c0_2 = arith.constant 0 : index
    %0 = vector.load %arg3[%c0, %c0_0, %c0_1, %c0_2] : memref<2x1x2x256xf32, #tpu.memory_space<vmem>>, vector<2x1x2x256xf32>
    %1 = vector.shape_cast %0 : vector<2x1x2x256xf32> to vector<2x2x256xf32>
    %c0_3 = arith.constant 0 : index
    %c0_4 = arith.constant 0 : index
    %c0_5 = arith.constant 0 : index
    %2 = vector.load %arg4[%c0_3, %c0_4, %c0_5] : memref<2x2x256xf32, #tpu.memory_space<vmem>>, vector<2x2x256xf32>
    tpu.vector_store %arg4[%c0_3, %c0_4, %c0_5], %1 {strides = array<i32>} : memref<2x2x256xf32, #tpu.memory_space<vmem>>, vector<2x2x256xf32>,
    return
  }
  func.func @transform_0(%arg0: i32, %arg1: i32, %arg2: i32) -> (i32, i32, i32, i32) {
    %c0_i32 = arith.constant 0 : i32
    %c0_i32_0 = arith.constant 0 : i32
    return %arg0, %arg1, %c0_i32, %arg2 : i32, i32, i32, i32
  }
  func.func @transform_1(%arg0: i32, %arg1: i32, %arg2: i32) -> (i32, i32, i32) {
    %c1_i32 = arith.constant 1 : i32
    %0 = arith.muli %arg1, %c1_i32 : i32
    %1 = arith.addi %0, %arg2 : i32
    %c0_i32 = arith.constant 0 : i32
    %c0_i32_0 = arith.constant 0 : i32
    return %arg0, %c0_i32, %1 : i32, i32, i32
  }
}

</mosaic_0001>

<bundles_post_ra>
// kernel: tpu_custom_call.1
= control target key start
LH: loop header
LB: loop body
LE: loop exit
PB: predicated region body
PF: predicated region fallthrough
CT: control target
= control target key end

     0   :  { %6 = vsyncpa [#allocation3], 0  ;;  %s677_s0 = inlined_call_operand.hbm [shape: f32[2,2,2,256], index: 0, kind: input, shape index: {}]   ;;  %s678_s1 = inlined_call_operand.hbm [shape: f32[2,2,512], index: 1, kind: output, shape index: {}]  }
   0x1   :  { %8 = vsyncpa [#allocation3 + $0x1], 0 }
   0x2   :  { %9 = vsyncpa [#allocation4], 0 }
   0x3   :  { %11 = vsyncpa [#allocation4 + $0x1], 0  ;;  %s504_s6 = smov 0   ;;  %s506_s7 = smov 0  }
   0x4   :  { %s508_s8 = smov 0   ;;  %s510_s9 = smov 0  }
   0x5   :  { %s512_s10 = smov 0   ;;  %s514_s11 = smov 0  }
   0x6 LB: > { %s287_s12 = sadd.s32 4294967295, %s484_s11   ;;  %s288_s13 = sadd.s32 4294967294, %s484_s11   ;;  %s484_s11 = sphi %s514_s11, %s17_s11   ;;  %s480_s10 = sphi %s512_s10, %s692_s10   ;;  %s476_s9 = sphi %s510_s9, %s691_s9   ;;  %s472_s8 = sphi %s508_s8, %s690_s8   ;;  %s468_s7 = sphi %s506_s7, %s689_s7   ;;  %s464_s6 = sphi %s504_s6, %s688_s6  }
   0x7   : > { %s32_s14 = sadd.s32 1, %s480_s10  ;;  %s47_s15 = sadd.s32 1, %s472_s8 }
   0x8   : > { %p34_p0 = scmp.ge.s32.totalorder %s32_s14, 2  ;;  %p54_p1 = scmp.ne.s32.totalorder %s472_s8, %s468_s7 }
   0x9   : > { %p55_p2 = scmp.eq.s32.totalorder %s484_s11, 0  ;;  %p60_p3 = scmp.ne.s32.totalorder %s468_s7, %s464_s6 }
   0xa   : > { %s694_s14 = smov (%p34_p0, %s32_s14), 0  ;;  %p61_p5 = scmp.eq.s32.totalorder %s287_s12, 0 }
   0xb   : > { %p545_p4 = por %p55_p2, %p54_p1  ;;  %s41_s17 = ssub.s32 %s480_s10, %s694_s14 }
   0xc   : > { %p88_p6 = scmp.eq.s32.totalorder %s287_s12, 1  ;;  %p45_p7 = scmp.eq.s32.totalorder %s41_s17, 0 }
   0xd   : > { %p551_p8 = por %p61_p5, %p60_p3  ;;  %p94_p10 = scmp.eq.s32.totalorder %s288_s13, 1 }
   0xe   : > { %p555_p9 = por %p88_p6, %p54_p1  ;;  %p316_p13 = scmp.lt.s32.totalorder %s484_s11, 2 }
   0xf   : > { %s560_s20 = scalar_select %p45_p7, %s472_s8, %s47_s15  }
  0x10   : > { %s682_s19 = scalar_select %p555_p9, 1, 0 }
  0x11   : > { %p562_p11 = por %p94_p10, %p60_p3  ;;  %s114_s22 = sand.u32 1, %s472_s8  }
  0x12   : > { %s291_s23 = sshll.u32 %s114_s22, 3  ;;  %s302_s24 = sshll.u32 %s480_s10, 6 }
  0x13   : > { %s683_s21 = scalar_select %p562_p11, 1, 0 }
  0x14   : > { %s573_s27 = scalar_lea.hbm %s677_s0, %s302_s24  ;;  %s118_s28 = scalar_lea.vmem [#allocation2], %s291_s23 }
  0x15   : > { %s130_s29 = sshll.u32 %s118_s28, 4  ;;  %p579_p0 = pnand %p316_p13, %p545_p4  ;;  %s575_s29 = int_to_ptr.vmem [resolvable:$true] %s130_s29 }
  0x16   : > { %s583_s2 = scalar_lea.sflag [#allocation3], %s114_s22  ;;  %s372_s3 = scalar_lea.hbm %s573_s27, 128 }
  0x17   : > { %p373_p1 = scmp.ne.s32.totalorder %s573_s27, %s372_s3  ;;  %p374_p2 = pneg %p579_p0 }
  0x18   : > { %s377_s12 = scalar_lea.hbm %s677_s0, 256  ;;  %p378_p4 = scmp.lt.u32.totalorder %s573_s27, %s677_s0 }
  0x19   : > { %p375_p3 = pnand %p374_p2, %p373_p1  ;;  %p379_p6 = scmp.lt.u32.totalorder %s377_s12, %s372_s3 }
  0x1a   : > { %p381_p10 = scmp.lt.u32.totalorder %s372_s3, %s573_s27 }
  0x1b   : > { %p376_p5 = pneg %p375_p3  ;;  %p380_p7 = por %p379_p6, %p378_p4 }
  0x1d   : > { %p382_p13 = por %p381_p10, %p380_p7 }
  0x1f   : > { %p383_p12 = pnand %p382_p13, %p376_p5 }
  0x21   : > { %386 = shalt.err (!%p383_p12)
}
  0x22   : > { %s387_s16 = scalar_lea.vmem %s575_s29, 128  ;;  %s486_s17 = smov [#allocation2]  }
  0x23   : > { %p388_p1 = scmp.ne.s32.totalorder %s575_s29, %s387_s16  ;;  %s392_s22 = sshll.u32 %s486_s17, 4  ;;  %s393_s22 = int_to_ptr.vmem [resolvable:$false] %s392_s22 }
  0x24   : > { %s394_s23 = scalar_lea.vmem %s393_s22, 256  ;;  %p395_p9 = scmp.lt.s32.totalorder %s575_s29, %s393_s22 }
  0x25   : > { %p390_p3 = pnand %p388_p1, %p374_p2  ;;  %p396_p4 = scmp.lt.s32.totalorder %s394_s23, %s387_s16 }
  0x27   : > { %p391_p11 = pneg %p390_p3  ;;  %p397_p6 = por %p396_p4, %p395_p9 }
  0x29   : > { %p398_p7 = pnand %p397_p6, %p391_p11 }
  0x2b   : > { %401 = shalt.err (!%p398_p7)
}
  0x2c   : > { %s487_s24 = smov 128   ;;  %s488_s25 = smov 64  }
  0x2d   : > { %s489_s26 = smov 4   ;;  %p294_p12 = scmp.ge.s32.totalorder %s484_s11, 1 }
  0x2e   : > { %311 = dma.hbm_to_vmem [thread:$0]  (!%p579_p0), %s573_s27, 128, %s575_s29, %s583_s2, %s487_s24, %s488_s25, %s489_s26  }
  0x2f   : > { %p138_p2 = scmp.lt.s32.totalorder %s484_s11, 3 }
  0x31   : > { %p139_p5 = pnand %p294_p12, %p138_p2 }
  0x32   : > { %s614_s28 = sand.u32 (!%p139_p5), 1, %s468_s7  }
  0x33   : > { %142 = sbr.rel (%p139_p5) target bundleno = 87 (0x57), region = 24  ;;  %s295_s3 = sshll.u32 (!%p139_p5), %s614_s28, 3 }
  0x34   : > { %s145_s4 = scalar_lea.sflag (!%p139_p5), [#allocation3], %s614_s28  ;;  %s148_s5 = scalar_lea.vmem (!%p139_p5), [#allocation2], %s295_s3 }
  0x3a   : > { %455 = dma.done.wait (%p551_p8), %s145_s4, 128  }
  0x3b   : > { %457 = vsyncadd (%p551_p8), %s145_s4, 4294967168  ;;  %s166_s27 = scalar_lea.vmem [#allocation5], %s295_s3  ;;  %s303_s30 = sshll.u32 %s476_s9, 6  ;;  %v172_v0 = vld [vmem:[%s148_s5] sm:$0xff]  }
  0x3c   : > { %s194_s29 = sshll.u32 %s166_s27, 4  ;;  %s628_s13 = scalar_lea.hbm %s678_s1, %s303_s30  ;;  %174 = vst [vmem:[%s166_s27] sm:$0xff] %v172_v0   ;;  %s623_s29 = int_to_ptr.vmem [resolvable:$true] %s194_s29 }
  0x3d   : > { %s177_s18 = scalar_lea.sflag [#allocation4], %s614_s28  ;;  %s402_s15 = scalar_lea.vmem %s623_s29, 128 }
  0x3e   : > { %p403_p8 = scmp.ne.s32.totalorder %s623_s29, %s402_s15  ;;  %p685_p9 = scmp.ne.s32.totalorder %s682_s19, 0 }
  0x3f   : > { %s490_s16 = smov [#allocation5]  }
  0x40   : > { %p404_p11 = pnand %p403_p8, %p685_p9  ;;  %s406_s9 = sshll.u32 %s490_s16, 4  ;;  %s407_s9 = int_to_ptr.vmem [resolvable:$false] %s406_s9 }
  0x41   : > { %s408_s17 = scalar_lea.vmem %s407_s9, 256  ;;  %p409_p10 = scmp.lt.s32.totalorder %s623_s29, %s407_s9 }
  0x42   : > { %p405_p0 = pneg %p404_p11  ;;  %p410_p13 = scmp.lt.s32.totalorder %s408_s17, %s402_s15 }
  0x44   : > { %p411_p1 = por %p410_p13, %p409_p10 }
  0x46   : > { %p412_p3 = pnand %p411_p1, %p405_p0 }
  0x48   : > { %415 = shalt.err (!%p412_p3)
}
  0x49   : > { %s416_s22 = scalar_lea.hbm %s628_s13, 128  ;;  %s420_s25 = scalar_lea.hbm %s678_s1, 256 }
  0x4a   : > { %p417_p4 = scmp.ne.s32.totalorder %s628_s13, %s416_s22  ;;  %p421_p12 = scmp.lt.u32.totalorder %s628_s13, %s678_s1 }
  0x4b   : > { %p422_p2 = scmp.lt.u32.totalorder %s420_s25, %s416_s22  ;;  %p424_p8 = scmp.lt.u32.totalorder %s416_s22, %s628_s13 }
  0x4c   : > { %p418_p6 = pnand %p417_p4, %p685_p9 }
  0x4d   : > { %p423_p5 = por %p422_p2, %p421_p12 }
  0x4e   : > { %p419_p7 = pneg %p418_p6 }
  0x4f   : > { %p425_p11 = por %p424_p8, %p423_p5 }
  0x51   : > { %p426_p0 = pnand %p425_p11, %p419_p7 }
  0x53   : > { %429 = shalt.err (!%p426_p0)
}
  0x54   : > { %s491_s4 = smov 64   ;;  %s492_s5 = smov 128  }
  0x55   : > { %s493_s27 = smov 4  }
  0x56   : > { %306 = dma.vmem_to_hbm [thread:$0]  (%p685_p9), %s623_s29, 128, %s628_s13, %s177_s18, %s491_s4, %s492_s5, %s493_s27  }
  0x57 PF: > { %s209_s30 = sand.u32 1, %s464_s6   ;;  %p686_p10 = scmp.ne.s32.totalorder %s683_s21, 0 }
  0x58   : > { %p687_p13 = scmp.ge.s32.totalorder %s484_s11, 2  ;;  %s210_s2 = scalar_lea.sflag [#allocation4], %s209_s30 }
  0x5a   : > { %p313_p1 = pnand %p687_p13, %p686_p10 }
  0x5c   : > { %459 = dma.done.wait (!%p313_p1), %s210_s2, 128  }
  0x5d   : > { %461 = vsyncadd (!%p313_p1), %s210_s2, 4294967168  ;;  %s17_s11 = sadd.s32 1, %s484_s11   ;;  %s688_s6 = smov %s468_s7 }
  0x5e   : > { %p14_p3 = scmp.ge.s32.totalorder %s17_s11, 4   ;;  %s689_s7 = smov %s472_s8 }
  0x5f   : > { %s690_s8 = smov %s560_s20  ;;  %s691_s9 = smov %s480_s10 }
  0x60   : > { %s692_s10 = smov %s694_s14  ;;  %16 = sbr.rel (!%p14_p3) target bundleno = 6 (0x6), region = 69 }
  0x67   :  { %215 = vsyncpa [#allocation3], 1 }
  0x68   :  { %217 = vsyncpa [#allocation3 + $0x1], 1 }
  0x69   :  { %218 = vsyncpa [#allocation4], 1 }
  0x6a   :  { %220 = vsyncpa [#allocation4 + $0x1], 1 }

</bundles_post_ra>
